<compile_context>
chip_gen: v6e
topology: v6e:2x2x1
jax: 0.10.0
libtpu: 0.0.40
codegen_flags: <defaults>
</compile_context>

<pallas_src>
import jax
import jax.numpy as jnp
from jax import lax
from jax.experimental import pallas as pl
from jax.experimental.pallas import tpu as pltpu

B = 2       # batch
T = 16      # sequence length
E = 8       # embedding_dim
H = 32      # hidden_size
K = 3       # kernel_size_1 == kernel_size_2 == 3
BT = B * T
C2_OFF = 32                  # conv2 weight row offset (conv1 block 24 rows, padded to 32)
W_ROWS = C2_OFF + K * H      # 128 packed weight rows
EPS = 1e-5                   # nn.LayerNorm default eps

assert T & (T - 1) == 0, "boundary-mask trick assumes power-of-two T"

# TODO(synk): training-mode Dropout (pltpu.prng_*) not emitted; eval mode => identity.


def _layer_norm(h, gamma, beta):
    mean = jnp.mean(h, axis=-1, keepdims=True)
    cent = h - mean
    var = jnp.mean(cent * cent, axis=-1, keepdims=True)
    return cent * lax.rsqrt(var + EPS) * gamma + beta


def duration_predictor_kernel(
    x_ref,   # (BT, E)      f32   VMEM — raw input rows
    w_ref,   # (128, H)     bf16  VMEM — packed conv1 (0:24) + conv2 (32:128) weights
    v_ref,   # (8, H)       f32   VMEM — [b1, g1, be1, b2, g2, be2, wl, bl@[7,0]]
    o_ref,   # (1, BT)      f32   VMEM — lane-dense output row
):
    v = v_ref[...]                                   # (8, H) f32, one load
    b1, g1, be1 = v[0:1, :], v[1:2, :], v[2:3, :]
    b2, g2, be2 = v[3:4, :], v[4:5, :], v[5:6, :]
    wl = v[6:7, :].astype(jnp.bfloat16)              # Linear weight (1, H)
    bl = v[7:8, 0:1]                                 # Linear bias  (1, 1)

    # Position-within-sequence masks from a single (BT,1) iota; broadcast along lanes.
    t_idx = lax.broadcasted_iota(jnp.int32, (BT, 1), 0) & (T - 1)
    not_first = t_idx != 0
    not_last = t_idx != T - 1

    # ---- Conv1d(E -> H, k=3, 'same'): shifted taps via XLU roll + edge masks,
    #      three accumulated MXU dots (bf16 operands, f32 accumulation). ----
    x = x_ref[...]                                                        # (BT, E) f32
    x_prev = jnp.where(not_first, pltpu.roll(x, shift=1, axis=0), 0.0).astype(jnp.bfloat16)
    x_next = jnp.where(not_last, pltpu.roll(x, shift=BT - 1, axis=0), 0.0).astype(jnp.bfloat16)
    xb = x.astype(jnp.bfloat16)
    h = (jnp.dot(x_prev, w_ref[0:E, :],         preferred_element_type=jnp.float32)
         + jnp.dot(xb,   w_ref[E:2 * E, :],     preferred_element_type=jnp.float32)
         + jnp.dot(x_next, w_ref[2 * E:3 * E, :], preferred_element_type=jnp.float32))
    h = jnp.maximum(h + b1, 0.0)                                          # f32
    h = _layer_norm(h, g1, be1)                                           # (BT, H) f32

    # ---- Conv1d(H -> H, k=3, 'same'): same trick, three accumulated dots. ----
    h_prev = jnp.where(not_first, pltpu.roll(h, shift=1, axis=0), 0.0).astype(jnp.bfloat16)
    h_next = jnp.where(not_last, pltpu.roll(h, shift=BT - 1, axis=0), 0.0).astype(jnp.bfloat16)
    hb = h.astype(jnp.bfloat16)
    h2 = (jnp.dot(h_prev, w_ref[C2_OFF:C2_OFF + H, :],             preferred_element_type=jnp.float32)
          + jnp.dot(hb,   w_ref[C2_OFF + H:C2_OFF + 2 * H, :],     preferred_element_type=jnp.float32)
          + jnp.dot(h_next, w_ref[C2_OFF + 2 * H:C2_OFF + 3 * H, :], preferred_element_type=jnp.float32))
    h2 = jnp.maximum(h2 + b2, 0.0)                                        # f32
    h2 = _layer_norm(h2, g2, be2)                                         # (BT, H) f32

    # ---- Linear(H -> 1) as ONE (1,H) x (BT,H)^T contraction -> (1, BT) lane-dense store ----
    out = lax.dot_general(wl, h2.astype(jnp.bfloat16),
                          dimension_numbers=(((1,), (1,)), ((), ())),
                          preferred_element_type=jnp.float32)             # (1, BT) f32
    o_ref[...] = (out + bl).astype(o_ref.dtype)


@jax.jit
def duration_predictor(x, params):
    """x: (B, T, E) float32 -> (B, T) float32."""
    w_all, v_all = params
    x2d = x.reshape(BT, E)                           # free reshape, no pad/concat
    out = pl.pallas_call(
        duration_predictor_kernel,
        out_shape=jax.ShapeDtypeStruct((1, BT), jnp.float32),
        in_specs=[pl.BlockSpec(memory_space=pltpu.MemorySpace.VMEM)] * 3,
        out_specs=pl.BlockSpec(memory_space=pltpu.MemorySpace.VMEM),
    )(x2d, w_all, v_all)
    return out.reshape(B, T)                         # free reshape of the (1, BT) row


def make_params(key):
    """PyTorch-layout init, then pack into the kernel's two arrays (off the hot path)."""
    ks = jax.random.split(key, 6)
    u = lambda k, shape, s: jax.random.uniform(k, shape, jnp.float32, -s, s)
    s1 = 1.0 / (E * K) ** 0.5
    s2 = 1.0 / (H * K) ** 0.5
    s3 = 1.0 / H ** 0.5
    w1_t = u(ks[0], (H, E, K), s1)          # Conv1d(E->H) weight (C_out, C_in, K)
    b1 = u(ks[1], (H,), s1)
    w2_t = u(ks[2], (H, H, K), s2)          # Conv1d(H->H) weight (C_out, C_in, K)
    b2 = u(ks[3], (H,), s2)
    wl = u(ks[4], (H,), s3)                 # Linear(H->1) weight row
    bl = u(ks[5], (), s3)                   # Linear bias (scalar)
    g1 = jnp.ones((H,), jnp.float32)
    be1 = jnp.zeros((H,), jnp.float32)
    g2 = jnp.ones((H,), jnp.float32)
    be2 = jnp.zeros((H,), jnp.float32)

    # (C_out, C_in, K) -> (K, C_in, C_out) -> (K*C_in, C_out): tap 0 = t-1, tap 1 = t, tap 2 = t+1
    w1c = jnp.transpose(w1_t, (2, 1, 0)).reshape(K * E, H)
    w2c = jnp.transpose(w2_t, (2, 1, 0)).reshape(K * H, H)
    # Packed bf16 weight stack: conv1 rows 0:24 (padded to 32), conv2 rows 32:128.
    w_all = jnp.concatenate(
        [w1c, jnp.zeros((C2_OFF - K * E, H), jnp.float32), w2c], axis=0
    ).astype(jnp.bfloat16)                                           # (128, H)
    # Packed f32 vector stack: b1, g1, be1, b2, g2, be2, wl, bl (at [7, 0]).
    bl_row = jnp.zeros((H,), jnp.float32).at[0].set(bl)
    v_all = jnp.stack([b1, g1, be1, b2, g2, be2, wl, bl_row], axis=0)  # (8, H)
    return (w_all, v_all)


def duration_predictor_reference(x, params):
    """Pure-JAX reference mirroring the PyTorch module (eval mode), from packed params."""
    w_all, v_all = params
    w_f32 = w_all.astype(jnp.float32)
    w1 = w_f32[:K * E].reshape(K, E, H)
    w2 = w_f32[C2_OFF:C2_OFF + K * H].reshape(K, H, H)
    b1, g1, be1 = v_all[0], v_all[1], v_all[2]
    b2, g2, be2 = v_all[3], v_all[4], v_all[5]
    wl, bl = v_all[6], v_all[7, 0]
    hi = jax.lax.Precision.HIGHEST

    x_pad = jnp.pad(x, ((0, 0), (1, 1), (0, 0)))
    h = sum(jnp.einsum("bte,eh->bth", x_pad[:, k:k + T, :], w1[k], precision=hi)
            for k in range(K)) + b1
    h = jnp.maximum(h, 0.0)
    h = _layer_norm(h, g1, be1)

    h_pad = jnp.pad(h, ((0, 0), (1, 1), (0, 0)))
    h2 = sum(jnp.einsum("bth,hj->btj", h_pad[:, k:k + T, :], w2[k], precision=hi)
             for k in range(K)) + b2
    h2 = jnp.maximum(h2, 0.0)
    h2 = _layer_norm(h2, g2, be2)

    return jnp.einsum("bth,h->bt", h2, wl, precision=hi) + bl


if __name__ == "__main__":
    key = jax.random.PRNGKey(0)
    kx, kp = jax.random.split(key)
    x = jax.random.normal(kx, (B, T, E), jnp.float32)
    params = make_params(kp)

    y = jax.block_until_ready(duration_predictor(x, params))
    assert y.shape == (B, T), y.shape
    assert bool(jnp.all(jnp.isfinite(y)))

    y_ref = jax.block_until_ready(duration_predictor_reference(x, params))
    err = float(jnp.max(jnp.abs(y - y_ref)))
    assert err < 5e-2, f"kernel/reference mismatch: max abs err = {err}"
    print("KERNEL_OK")
</pallas_src>

<mosaic_0001>
module attributes {stable_mosaic.version = 11 : i64} {
  func.func @duration_predictor_kernel(%arg0: memref<32x8xf32, #tpu.memory_space<vmem>>, %arg1: memref<128x32xbf16, #tpu.memory_space<vmem>>, %arg2: memref<8x32xf32, #tpu.memory_space<vmem>>, %arg3: memref<1x32xf32, #tpu.memory_space<vmem>>) attributes {dimension_semantics = [], scalar_prefetch = 0 : i64, scratch_operands = 0 : i64, tpu.core_type = #tpu.core_type<tc>} {
    %c0 = arith.constant 0 : index
    %c0_0 = arith.constant 0 : index
    %0 = vector.load %arg2[%c0, %c0_0] : memref<8x32xf32, #tpu.memory_space<vmem>>, vector<8x32xf32>
    %1 = vector.extract_strided_slice %0 {offsets = [0, 0], sizes = [1, 32], strides = [1, 1]} : vector<8x32xf32> to vector<1x32xf32>
    %2 = vector.extract_strided_slice %0 {offsets = [1, 0], sizes = [1, 32], strides = [1, 1]} : vector<8x32xf32> to vector<1x32xf32>
    %3 = vector.extract_strided_slice %0 {offsets = [2, 0], sizes = [1, 32], strides = [1, 1]} : vector<8x32xf32> to vector<1x32xf32>
    %4 = vector.extract_strided_slice %0 {offsets = [3, 0], sizes = [1, 32], strides = [1, 1]} : vector<8x32xf32> to vector<1x32xf32>
    %5 = vector.extract_strided_slice %0 {offsets = [4, 0], sizes = [1, 32], strides = [1, 1]} : vector<8x32xf32> to vector<1x32xf32>
    %6 = vector.extract_strided_slice %0 {offsets = [5, 0], sizes = [1, 32], strides = [1, 1]} : vector<8x32xf32> to vector<1x32xf32>
    %7 = vector.extract_strided_slice %0 {offsets = [6, 0], sizes = [1, 32], strides = [1, 1]} : vector<8x32xf32> to vector<1x32xf32>
    %8 = arith.truncf %7 : vector<1x32xf32> to vector<1x32xbf16>
    %9 = vector.extract_strided_slice %0 {offsets = [7, 0], sizes = [1, 1], strides = [1, 1]} : vector<8x32xf32> to vector<1x1xf32>
    %10 = tpu.iota {dimensions = array<i32: 0>} : vector<32x1xi32>
    %c15_i32 = arith.constant 15 : i32
    %11 = vector.broadcast %c15_i32 : i32 to vector<32x1xi32>
    %12 = arith.andi %10, %11 : vector<32x1xi32>
    %c0_i32 = arith.constant 0 : i32
    %13 = vector.broadcast %c0_i32 : i32 to vector<32x1xi32>
    %14 = arith.cmpi ne, %12, %13 : vector<32x1xi32>
    %c15_i32_1 = arith.constant 15 : i32
    %15 = vector.broadcast %c15_i32_1 : i32 to vector<32x1xi32>
    %16 = arith.cmpi ne, %12, %15 : vector<32x1xi32>
    %c0_2 = arith.constant 0 : index
    %c0_3 = arith.constant 0 : index
    %17 = vector.load %arg0[%c0_2, %c0_3] : memref<32x8xf32, #tpu.memory_space<vmem>>, vector<32x8xf32>
    %c1_i32 = arith.constant 1 : i32
    %18 = tpu.dynamic_rotate %17 by %c1_i32 dim 0 : vector<32x8xf32>, i32 -> vector<32x8xf32>
    %cst = arith.constant 0.000000e+00 : f32
    %19 = vector.shape_cast %14 : vector<32x1xi1> to vector<32x1xi1>
    %20 = vector.broadcast %19 : vector<32x1xi1> to vector<32x8xi1>
    %21 = vector.broadcast %cst : f32 to vector<32x8xf32>
    %22 = arith.select %20, %18, %21 : vector<32x8xi1>, vector<32x8xf32>
    %23 = arith.truncf %22 : vector<32x8xf32> to vector<32x8xbf16>
    %c31_i32 = arith.constant 31 : i32
    %24 = tpu.dynamic_rotate %17 by %c31_i32 dim 0 : vector<32x8xf32>, i32 -> vector<32x8xf32>
    %cst_4 = arith.constant 0.000000e+00 : f32
    %25 = vector.shape_cast %16 : vector<32x1xi1> to vector<32x1xi1>
    %26 = vector.broadcast %25 : vector<32x1xi1> to vector<32x8xi1>
    %27 = vector.broadcast %cst_4 : f32 to vector<32x8xf32>
    %28 = arith.select %26, %24, %27 : vector<32x8xi1>, vector<32x8xf32>
    %29 = arith.truncf %28 : vector<32x8xf32> to vector<32x8xbf16>
    %30 = arith.truncf %17 : vector<32x8xf32> to vector<32x8xbf16>
    %c0_5 = arith.constant 0 : index
    %c0_6 = arith.constant 0 : index
    %31 = vector.load %arg1[%c0_5, %c0_6] : memref<128x32xbf16, #tpu.memory_space<vmem>>, vector<8x32xbf16>
    %cst_7 = arith.constant dense<0.000000e+00> : vector<32x32xf32>
    %32 = tpu.matmul %23, %31, %cst_7 {dimension_numbers = #tpu.dot_dimension_numbers<[1], [0], [0], [1], [0, 0, 1, 1], [], []>} : vector<32x8xbf16>, vector<8x32xbf16>, vector<32x32xf32> -> vector<32x32xf32>
    %c8 = arith.constant 8 : index
    %c0_8 = arith.constant 0 : index
    %33 = vector.load %arg1[%c8, %c0_8] : memref<128x32xbf16, #tpu.memory_space<vmem>>, vector<8x32xbf16>
    %cst_9 = arith.constant dense<0.000000e+00> : vector<32x32xf32>
    %34 = tpu.matmul %30, %33, %cst_9 {dimension_numbers = #tpu.dot_dimension_numbers<[1], [0], [0], [1], [0, 0, 1, 1], [], []>} : vector<32x8xbf16>, vector<8x32xbf16>, vector<32x32xf32> -> vector<32x32xf32>
    %35 = arith.addf %32, %34 : vector<32x32xf32>
    %c16 = arith.constant 16 : index
    %c0_10 = arith.constant 0 : index
    %36 = vector.load %arg1[%c16, %c0_10] : memref<128x32xbf16, #tpu.memory_space<vmem>>, vector<8x32xbf16>
    %cst_11 = arith.constant dense<0.000000e+00> : vector<32x32xf32>
    %37 = tpu.matmul %29, %36, %cst_11 {dimension_numbers = #tpu.dot_dimension_numbers<[1], [0], [0], [1], [0, 0, 1, 1], [], []>} : vector<32x8xbf16>, vector<8x32xbf16>, vector<32x32xf32> -> vector<32x32xf32>
    %38 = arith.addf %35, %37 : vector<32x32xf32>
    %39 = vector.broadcast %1 : vector<1x32xf32> to vector<32x32xf32>
    %40 = arith.addf %38, %39 : vector<32x32xf32>
    %cst_12 = arith.constant 0.000000e+00 : f32
    %41 = vector.broadcast %cst_12 : f32 to vector<32x32xf32>
    %42 = arith.maximumf %40, %41 : vector<32x32xf32>
    %cst_13 = arith.constant dense<0.000000e+00> : vector<32xf32>
    %43 = vector.multi_reduction <add>, %42, %cst_13 [1] : vector<32x32xf32> to vector<32xf32>
    %44 = vector.shape_cast %43 : vector<32xf32> to vector<32x1xf32>
    %cst_14 = arith.constant 3.200000e+01 : f32
    %45 = vector.broadcast %cst_14 : f32 to vector<32x1xf32>
    %46 = arith.divf %44, %45 : vector<32x1xf32>
    %47 = vector.broadcast %46 : vector<32x1xf32> to vector<32x32xf32>
    %48 = arith.subf %42, %47 : vector<32x32xf32>
    %49 = arith.mulf %48, %48 : vector<32x32xf32>
    %cst_15 = arith.constant dense<0.000000e+00> : vector<32xf32>
    %50 = vector.multi_reduction <add>, %49, %cst_15 [1] : vector<32x32xf32> to vector<32xf32>
    %51 = vector.shape_cast %50 : vector<32xf32> to vector<32x1xf32>
    %cst_16 = arith.constant 3.200000e+01 : f32
    %52 = vector.broadcast %cst_16 : f32 to vector<32x1xf32>
    %53 = arith.divf %51, %52 : vector<32x1xf32>
    %cst_17 = arith.constant 9.99999974E-6 : f32
    %54 = vector.broadcast %cst_17 : f32 to vector<32x1xf32>
    %55 = arith.addf %53, %54 : vector<32x1xf32>
    %56 = math.rsqrt %55 : vector<32x1xf32>
    %57 = vector.broadcast %56 : vector<32x1xf32> to vector<32x32xf32>
    %58 = arith.mulf %48, %57 : vector<32x32xf32>
    %59 = vector.broadcast %2 : vector<1x32xf32> to vector<32x32xf32>
    %60 = arith.mulf %58, %59 : vector<32x32xf32>
    %61 = vector.broadcast %3 : vector<1x32xf32> to vector<32x32xf32>
    %62 = arith.addf %60, %61 : vector<32x32xf32>
    %c1_i32_18 = arith.constant 1 : i32
    %63 = tpu.dynamic_rotate %62 by %c1_i32_18 dim 0 : vector<32x32xf32>, i32 -> vector<32x32xf32>
    %cst_19 = arith.constant 0.000000e+00 : f32
    %64 = vector.shape_cast %14 : vector<32x1xi1> to vector<32x1xi1>
    %65 = vector.broadcast %64 : vector<32x1xi1> to vector<32x32xi1>
    %66 = vector.broadcast %cst_19 : f32 to vector<32x32xf32>
    %67 = arith.select %65, %63, %66 : vector<32x32xi1>, vector<32x32xf32>
    %68 = arith.truncf %67 : vector<32x32xf32> to vector<32x32xbf16>
    %c31_i32_20 = arith.constant 31 : i32
    %69 = tpu.dynamic_rotate %62 by %c31_i32_20 dim 0 : vector<32x32xf32>, i32 -> vector<32x32xf32>
    %cst_21 = arith.constant 0.000000e+00 : f32
    %70 = vector.shape_cast %16 : vector<32x1xi1> to vector<32x1xi1>
    %71 = vector.broadcast %70 : vector<32x1xi1> to vector<32x32xi1>
    %72 = vector.broadcast %cst_21 : f32 to vector<32x32xf32>
    %73 = arith.select %71, %69, %72 : vector<32x32xi1>, vector<32x32xf32>
    %74 = arith.truncf %73 : vector<32x32xf32> to vector<32x32xbf16>
    %75 = arith.truncf %62 : vector<32x32xf32> to vector<32x32xbf16>
    %c32 = arith.constant 32 : index
    %c0_22 = arith.constant 0 : index
    %76 = vector.load %arg1[%c32, %c0_22] : memref<128x32xbf16, #tpu.memory_space<vmem>>, vector<32x32xbf16>
    %cst_23 = arith.constant dense<0.000000e+00> : vector<32x32xf32>
    %77 = tpu.matmul %68, %76, %cst_23 {dimension_numbers = #tpu.dot_dimension_numbers<[1], [0], [0], [1], [0, 0, 1, 1], [], []>} : vector<32x32xbf16>, vector<32x32xbf16>, vector<32x32xf32> -> vector<32x32xf32>
    %c64 = arith.constant 64 : index
    %c0_24 = arith.constant 0 : index
    %78 = vector.load %arg1[%c64, %c0_24] : memref<128x32xbf16, #tpu.memory_space<vmem>>, vector<32x32xbf16>
    %cst_25 = arith.constant dense<0.000000e+00> : vector<32x32xf32>
    %79 = tpu.matmul %75, %78, %cst_25 {dimension_numbers = #tpu.dot_dimension_numbers<[1], [0], [0], [1], [0, 0, 1, 1], [], []>} : vector<32x32xbf16>, vector<32x32xbf16>, vector<32x32xf32> -> vector<32x32xf32>
    %80 = arith.addf %77, %79 : vector<32x32xf32>
    %c96 = arith.constant 96 : index
    %c0_26 = arith.constant 0 : index
    %81 = vector.load %arg1[%c96, %c0_26] : memref<128x32xbf16, #tpu.memory_space<vmem>>, vector<32x32xbf16>
    %cst_27 = arith.constant dense<0.000000e+00> : vector<32x32xf32>
    %82 = tpu.matmul %74, %81, %cst_27 {dimension_numbers = #tpu.dot_dimension_numbers<[1], [0], [0], [1], [0, 0, 1, 1], [], []>} : vector<32x32xbf16>, vector<32x32xbf16>, vector<32x32xf32> -> vector<32x32xf32>
    %83 = arith.addf %80, %82 : vector<32x32xf32>
    %84 = vector.broadcast %4 : vector<1x32xf32> to vector<32x32xf32>
    %85 = arith.addf %83, %84 : vector<32x32xf32>
    %cst_28 = arith.constant 0.000000e+00 : f32
    %86 = vector.broadcast %cst_28 : f32 to vector<32x32xf32>
    %87 = arith.maximumf %85, %86 : vector<32x32xf32>
    %cst_29 = arith.constant dense<0.000000e+00> : vector<32xf32>
    %88 = vector.multi_reduction <add>, %87, %cst_29 [1] : vector<32x32xf32> to vector<32xf32>
    %89 = vector.shape_cast %88 : vector<32xf32> to vector<32x1xf32>
    %cst_30 = arith.constant 3.200000e+01 : f32
    %90 = vector.broadcast %cst_30 : f32 to vector<32x1xf32>
    %91 = arith.divf %89, %90 : vector<32x1xf32>
    %92 = vector.broadcast %91 : vector<32x1xf32> to vector<32x32xf32>
    %93 = arith.subf %87, %92 : vector<32x32xf32>
    %94 = arith.mulf %93, %93 : vector<32x32xf32>
    %cst_31 = arith.constant dense<0.000000e+00> : vector<32xf32>
    %95 = vector.multi_reduction <add>, %94, %cst_31 [1] : vector<32x32xf32> to vector<32xf32>
    %96 = vector.shape_cast %95 : vector<32xf32> to vector<32x1xf32>
    %cst_32 = arith.constant 3.200000e+01 : f32
    %97 = vector.broadcast %cst_32 : f32 to vector<32x1xf32>
    %98 = arith.divf %96, %97 : vector<32x1xf32>
    %cst_33 = arith.constant 9.99999974E-6 : f32
    %99 = vector.broadcast %cst_33 : f32 to vector<32x1xf32>
    %100 = arith.addf %98, %99 : vector<32x1xf32>
    %101 = math.rsqrt %100 : vector<32x1xf32>
    %102 = vector.broadcast %101 : vector<32x1xf32> to vector<32x32xf32>
    %103 = arith.mulf %93, %102 : vector<32x32xf32>
    %104 = vector.broadcast %5 : vector<1x32xf32> to vector<32x32xf32>
    %105 = arith.mulf %103, %104 : vector<32x32xf32>
    %106 = vector.broadcast %6 : vector<1x32xf32> to vector<32x32xf32>
    %107 = arith.addf %105, %106 : vector<32x32xf32>
    %108 = arith.truncf %107 : vector<32x32xf32> to vector<32x32xbf16>
    %cst_34 = arith.constant dense<0.000000e+00> : vector<1x32xf32>
    %109 = tpu.matmul %8, %108, %cst_34 {dimension_numbers = #tpu.dot_dimension_numbers<[1], [1], [0], [0], [0, 0, 1, 0], [], []>} : vector<1x32xbf16>, vector<32x32xbf16>, vector<1x32xf32> -> vector<1x32xf32>
    %110 = vector.broadcast %9 : vector<1x1xf32> to vector<1x32xf32>
    %111 = arith.addf %109, %110 : vector<1x32xf32>
    %c0_35 = arith.constant 0 : index
    %c0_36 = arith.constant 0 : index
    %112 = vector.load %arg3[%c0_35, %c0_36] : memref<1x32xf32, #tpu.memory_space<vmem>>, vector<1x32xf32>
    tpu.vector_store %arg3[%c0_35, %c0_36], %111 {strides = array<i32>} : memref<1x32xf32, #tpu.memory_space<vmem>>, vector<1x32xf32>,
    return
  }
}

</mosaic_0001>

<bundles_post_ra>
// kernel: duration_predictor.1
= control target key start
LH: loop header
LB: loop body
LE: loop exit
PB: predicated region body
PF: predicated region fallthrough
CT: control target
= control target key end

     0   :  { %vm95_vm0 = vcmask 1043456   ;;  %v17_v0 = vlaneseq  ;;  %vm88_vm1 = vcmask 64512   ;;  %vm281_vm8 = vcmask 261120   ;;  %s1059_s1 = inlined_call_operand.vmem [shape: bf16[128,32], index: 1, kind: input, shape index: {}]   ;;  %s1060_s0 = inlined_call_operand.vmem [shape: f32[32,8], index: 0, kind: input, shape index: {}]   ;;  %s1061_s2 = inlined_call_operand.vmem [shape: f32[8,32], index: 2, kind: input, shape index: {}]   ;;  %s1062_s3 = inlined_call_operand.vmem [shape: f32[1,32], index: 3, kind: output, shape index: {}]  }
   0x1   :  { %v87_v1 = vld [vmem:[%s1059_s1 + $0x4] sm:$0xf]  ;;  %v35_v3 = vld [vmem:[%s1060_s0 + $0x8] sm:$0xff]  ;;  %v36_v8 = vld [vmem:[%s1060_s0 + $0x10] sm:$0xff]  ;;  %vm866_vm9 = vmmov 0   ;;  %vm737_vm10 = vcmask 253952  }
   0x2   :  { %v34_v2 = vld [vmem:[%s1060_s0] sm:$0xff]  ;;  %836 = vmatprep.subr.msk.bf16.mxu1 %vm95_vm0, %v87_v1  ;;  %v97_v4 = vsel %vm95_vm0, %v87_v1, 0  ;;  %v39_v6 = vrot.slane %v35_v3, 7  ;;  %v37_v9 = vld [vmem:[%s1060_s0 + $0x18] sm:$0xff]  ;;  %v62_v10 = vrot.slane %v35_v3, 1  ;;  %v40_v12 = vrot.slane %v36_v8, 7 }
   0x3   :  { %v38_v5 = vrot.slane %v34_v2, 7  ;;  %v61_v7 = vrot.slane %v34_v2, 1  ;;  %787 = vmatpush3.bf16.msra.mxu1 %v97_v4  ;;  %v84_v11 = vpack.c.bf16 %v35_v3, %v34_v2  ;;  %v41_v13 = vrot.slane %v37_v9, 7  ;;  %v86_v14 = vld [vmem:[%s1059_s1] sm:$0xf] }
   0x4   :  { %v64_v15 = vrot.slane %v37_v9, 1  ;;  %v85_v16 = vpack.c.bf16 %v37_v9, %v36_v8  ;;  %837 = vmatprep.subr.msk.bf16.mxu1 %vm95_vm0, %v86_v14  ;;  %v155_v17 = vsel %vm95_vm0, %v86_v14, 0  ;;  %v206_v18 = vld [vmem:[%s1059_s1 + $0x8] sm:$0xf]  ;;  %v913_v19 = vshrl.u32 %v17_v0, 7  ;;  %v973_v54 = vld [vmem:[%s1061_s2] sm:$0xff] }
   0x5   :  { %788 = vmatprep.mubr.msk.bf16.mxu1 %vm88_vm1, %v84_v11  ;;  %838 = vmatprep.subr.msk.bf16.mxu0 %vm95_vm0, %v206_v18  ;;  %v214_v20 = vsel %vm95_vm0, %v206_v18, 0  ;;  %v63_v21 = vrot.slane %v36_v8, 1 }
   0x6   :  { %789 = vmatmul.mubr.msk.bf16.vlgmr.msra.gmra.mxu1 %vm88_vm1, %v85_v16  ;;  %799 = vmatpush3.bf16.msra.mxu0 %v214_v20  ;;  %v19_v22 = vadd.s32 8, %v913_v19  ;;  %vm65_vm2 = vcmp.lt.s32.totalorder %v913_v19, 7  ;;  %v22_v23 = vand.u32 15, %v913_v19  ;;  %vm42_vm3 = vcmp.lt.s32.totalorder %v913_v19, 1 }
   0x7   :  { %793 = vmatpush3.bf16.msra.mxu1 %v155_v17  ;;  %v45_v24 = vsel %vm42_vm3, %v38_v5, %v39_v6  ;;  %v46_v25 = vsel %vm42_vm3, %v41_v13, %v38_v5  ;;  %v67_v27 = vsel %vm65_vm2, %v62_v10, %v63_v21  ;;  %v21_v29 = vadd.s32 24, %v913_v19 }
   0x8   :  { %v23_v26 = vand.u32 15, %v19_v22  ;;  %vm929_vm4 = vcmp.ne.s32.totalorder %v22_v23, 0  ;;  %v68_v30 = vsel %vm65_vm2, %v61_v7, %v62_v10  ;;  %v20_v32 = vadd.s32 16, %v913_v19 }
   0x9   :  { %v55_v31 = vsel %vm929_vm4, %v46_v25, 0.0  ;;  %v25_v35 = vand.u32 15, %v21_v29  ;;  %v69_v36 = vsel %vm65_vm2, %v64_v15, %v61_v7  ;;  %v66_v38 = vsel %vm65_vm2, %v63_v21, %v64_v15 }
   0xa   :  { %vm939_vm5 = vcmp.ne.s32.totalorder %v23_v26, 15  ;;  %v59_v34 = vpack.c.bf16 %v45_v24, %v55_v31  ;;  %v24_v39 = vand.u32 15, %v20_v32  ;;  %v44_v40 = vsel %vm42_vm3, %v39_v6, %v40_v12 }
   0xb   :  { %v79_v37 = vsel %vm939_vm5, %v67_v27, 0.0  ;;  %vm952_vm6 = vcmp.ne.s32.totalorder %v25_v35, 15  ;;  %v43_v43 = vsel %vm42_vm3, %v40_v12, %v41_v13  ;;  %v271_v53 = vsub.s32 0, %v913_v19 }
   0xc   :  { %v82_v41 = vpack.c.bf16 %v79_v37, %v68_v30  ;;  %794 = vmatprep.mubr.msk.bf16.mxu1 %vm88_vm1, %v59_v34  ;;  %v81_v44 = vsel %vm952_vm6, %v69_v36, 0.0  ;;  %vm960_vm7 = vcmp.ne.s32.totalorder %v24_v39, 0  ;;  %v600_v45 = vsub.s32 3, %v913_v19 }
   0xd   :  { %v83_v46 = vpack.c.bf16 %v81_v44, %v66_v38  ;;  %v57_v47 = vsel %vm960_vm7, %v44_v40, 0.0  ;;  %v272_v59 = vrot.slane %v973_v54, %v271_v53  ;;  %v843_v44 = vld [vmem:[%s1059_s1 + $0x28] sm:$0xff]  }
   0xe   :  { %800 = vmatprep.mubr.msk.bf16.mxu0 %vm88_vm1, %v82_v41  ;;  %v60_v48 = vpack.c.bf16 %v43_v43, %v57_v47  ;;  %804 = vmatprep.subr.bf16.mxu1 %v843_v44  ;;  %v845_v47 = vld [vmem:[%s1059_s1 + $0x18] sm:$0xff]   ;;  %v601_v42 = vrot.slane %v973_v54, %v600_v45 }
   0xf   :  { %801 = vmatmul.mubr.msk.bf16.vlgmr.msra.gmra.mxu0 %vm88_vm1, %v83_v46  ;;  %v844_v46 = vld [vmem:[%s1059_s1 + $0x20] sm:$0xff]   ;;  %812 = vmatprep.subr.bf16.mxu0 %v845_v47 }
  0x10   :  { %795 = vmatmul.mubr.msk.bf16.vlgmr.msra.gmra.mxu1 %vm88_vm1, %v60_v48  ;;  %813 = vmatpush3.bf16.msra.mxu0 %v845_v47  ;;  %v846_v48 = vld [vmem:[%s1059_s1 + $0x38] sm:$0xff]  }
  0x11   :  { %805 = vmatpush3.bf16.msra.mxu1 %v843_v44 }
  0x12   :  { %806 = vmatprep.subr.bf16.mxu1 %v844_v46 }
  0x15   :  { %807 = vmatpush3.bf16.msra.mxu1 %v844_v46 }
  0x16   :  { %820 = vmatprep.subr.bf16.mxu1 %v846_v48 }
  0xc6   :  { %v790_v49 = vpop.f32.mrf.mxu1 }
  0xc8   :  { %v133_v50 = vpop.f32.mrf.mxu1 }
  0xca   :  { %v791_v51 = vpop.f32.mrf.mxu1 }
  0xcc   :  { %v136_v52 = vpop.f32.mrf.mxu1 }
  0xcf   :  { %v802_v55 = vpop.f32.mrf.mxu0 }
  0xd0   :  { %v796_v56 = vpop.f32.mrf.mxu1 }
  0xd1   :  { %v200_v57 = vadd.f32 %v796_v56, %v790_v49  ;;  %v250_v58 = vpop.f32.mrf.mxu0  ;;  %v847_v49 = vld [vmem:[%s1059_s1 + $0x10] sm:$0xff]  }
  0xd2   :  { %v191_v60 = vpop.f32.mrf.mxu1  ;;  %814 = vmatprep.subr.bf16.mxu0 %v847_v49 }
  0xd3   :  { %v267_v61 = vadd.f32 %v802_v55, %v200_v57  ;;  %v192_v62 = vadd.f32 %v191_v60, %v133_v50  ;;  %v803_v63 = vpop.f32.mrf.mxu0  ;;  %815 = vmatpush3.bf16.msra.mxu0 %v847_v49 }
  0xd4   :  { %v797_v0 = vpop.f32.mrf.mxu1 }
  0xd5   :  { %v265_v1 = vadd.f32 %v250_v58, %v192_v62  ;;  %v203_v2 = vadd.f32 %v797_v0, %v791_v51  ;;  %v275_v3 = vadd.f32 %v272_v59, %v267_v61  ;;  %v253_v9 = vpop.f32.mrf.mxu0 }
  0xd6   :  { %v194_v4 = vpop.f32.mrf.mxu1 }
  0xd7   :  { %v268_v5 = vadd.f32 %v803_v63, %v203_v2  ;;  %v195_v6 = vadd.f32 %v194_v4, %v136_v52  ;;  %v279_v7 = vmax.f32 %v275_v3, 0.0  ;;  %v273_v8 = vadd.f32 %v272_v59, %v265_v1 }
  0xd8   :  { %v337_v63 = vsub.s32 1, %v913_v19  ;;  %v345_v1 = vsub.s32 2, %v913_v19 }
  0xd9   :  { %v266_v10 = vadd.f32 %v253_v9, %v195_v6  ;;  %v288_v11 = vsel %vm281_vm8, %v279_v7, 0.0  ;;  %v277_v12 = vmax.f32 %v273_v8, 0.0  ;;  %v276_v13 = vadd.f32 %v272_v59, %v268_v5 }
  0xda   :  { %289 = vadd.xlane.f32.xlu1 %v288_v11  ;;  %v338_v0 = vrot.slane %v973_v54, %v337_v63  ;;  %v346_v5 = vrot.slane %v973_v54, %v345_v1 }
  0xdb   :  { %v282_v14 = vsel %vm281_vm8, %v277_v12, 0.0  ;;  %v280_v15 = vmax.f32 %v276_v13, 0.0  ;;  %v274_v16 = vadd.f32 %v272_v59, %v266_v10 }
  0xdc   :  { %283 = vadd.xlane.f32.xlu0 %v282_v14 }
  0xdd   :  { %v291_v17 = vsel %vm281_vm8, %v280_v15, 0.0  ;;  %v278_v18 = vmax.f32 %v274_v16, 0.0 }
  0xde   :  { %292 = vadd.xlane.f32.xlu1 %v291_v17 }
  0xdf   :  { %v285_v20 = vsel %vm281_vm8, %v278_v18, 0.0 }
  0xe0   :  { %286 = vadd.xlane.f32.xlu0 %v285_v20 }
 0x163   :  { %v290_v21 = vpop.xlane.xlu1 %289 }
 0x164   :  { %v297_v22 = vmul.f32 0.03125, %v290_v21 }
 0x165   :  { %v284_v23 = vpop.xlane.xlu0 %283 }
 0x166   :  { %v295_v24 = vmul.f32 0.03125, %v284_v23  ;;  %v301_v26 = vsub.f32 %v279_v7, %v297_v22 }
 0x167   :  { %v293_v25 = vpop.xlane.xlu1 %292 }
 0x168   :  { %v299_v27 = vsub.f32 %v277_v12, %v295_v24  ;;  %v298_v29 = vmul.f32 0.03125, %v293_v25  ;;  %v305_v37 = vmul.f32 %v301_v26, %v301_v26 }
 0x169   :  { %v287_v30 = vpop.xlane.xlu0 %286 }
 0x16a   :  { %v296_v31 = vmul.f32 0.03125, %v287_v30  ;;  %v303_v32 = vmul.f32 %v299_v27, %v299_v27  ;;  %v302_v34 = vsub.f32 %v280_v15, %v298_v29  ;;  %v313_v39 = vsel %vm281_vm8, %v305_v37, 0.0 }
 0x16c   :  { %v300_v35 = vsub.f32 %v278_v18, %v296_v31  ;;  %v307_v36 = vsel %vm281_vm8, %v303_v32, 0.0  ;;  %v306_v41 = vmul.f32 %v302_v34, %v302_v34 }
 0x16d   :  { %308 = vadd.xlane.f32.xlu0 %v307_v36 }
 0x16e   :  { %v304_v38 = vmul.f32 %v300_v35, %v300_v35  ;;  %v316_v43 = vsel %vm281_vm8, %v306_v41, 0.0 }
 0x170   :  { %v310_v40 = vsel %vm281_vm8, %v304_v38, 0.0 }
 0x171   :  { %314 = vadd.xlane.f32.xlu0 %v313_v39  ;;  %311 = vadd.xlane.f32.xlu1 %v310_v40 }
 0x175   :  { %317 = vadd.xlane.f32.xlu1 %v316_v43 }
 0x1f6   :  { %v309_v50 = vpop.xlane.xlu0 %308 }
 0x1f7   :  { %v319_v51 = vmul.f32 0.03125, %v309_v50 }
 0x1f9   :  { %v323_v52 = vadd.f32 1e-05, %v319_v51 }
 0x1fa   :  { %v312_v53 = vpop.xlane.xlu1 %311  ;;  %v315_v55 = vpop.xlane.xlu0 %314 }
 0x1fb   :  { %849 = vrsqrt.f32 %v323_v52  ;;  %v320_v56 = vmul.f32 0.03125, %v312_v53  ;;  %v321_v57 = vmul.f32 0.03125, %v315_v55 }
 0x1fd   :  { %v324_v58 = vadd.f32 1e-05, %v320_v56  ;;  %v325_v59 = vadd.f32 1e-05, %v321_v57 }
 0x1fe   :  { %v318_v60 = vpop.xlane.xlu1 %317 }
 0x1ff   :  { %851 = vrsqrt.f32 %v324_v58  ;;  %v322_v61 = vmul.f32 0.03125, %v318_v60 }
 0x200   :  { %853 = vrsqrt.f32 %v325_v59 }
 0x201   :  { %v326_v62 = vadd.f32 1e-05, %v322_v61 }
 0x203   :  { %855 = vrsqrt.f32 %v326_v62 }
 0x208   :  { %v850_v2 = vpop.eup %849 }
 0x209   :  { %v331_v3 = vmul.f32 %v850_v2, %v299_v27 }
 0x20b   :  { %v339_v4 = vmul.f32 %v338_v0, %v331_v3 }
 0x20c   :  { %v852_v6 = vpop.eup %851 }
 0x20d   :  { %v854_v7 = vpop.eup %853  ;;  %v332_v8 = vmul.f32 %v852_v6, %v300_v35  ;;  %v347_v11 = vadd.f32 %v346_v5, %v339_v4 }
 0x20e   :  { %v333_v9 = vmul.f32 %v854_v7, %v301_v26 }
 0x20f   :  { %v340_v10 = vmul.f32 %v338_v0, %v332_v8  ;;  %v365_v20 = vrot.slane %v347_v11, 1  ;;  %v351_v31 = vrot.slane %v347_v11, 7 }
 0x210   :  { %v856_v12 = vpop.eup %855  ;;  %v341_v13 = vmul.f32 %v338_v0, %v333_v9 }
 0x211   :  { %v334_v14 = vmul.f32 %v856_v12, %v302_v34  ;;  %v348_v15 = vadd.f32 %v346_v5, %v340_v10  ;;  %v848_v34 = vld [vmem:[%s1059_s1 + $0x30] sm:$0xff]  }
 0x212   :  { %v349_v16 = vadd.f32 %v346_v5, %v341_v13 }
 0x213   :  { %v342_v17 = vmul.f32 %v338_v0, %v334_v14  ;;  %v379_v18 = vpack.c.bf16 %v348_v15, %v347_v11  ;;  %v366_v21 = vrot.slane %v348_v15, 1  ;;  %v352_v23 = vrot.slane %v348_v15, 7 }
 0x214   :  { %v367_v22 = vrot.slane %v349_v16, 1  ;;  %v353_v24 = vrot.slane %v349_v16, 7 }
 0x215   :  { %808 = vmatprep.mubr.msk.bf16.mxu1 %vm281_vm8, %v379_v18  ;;  %v350_v25 = vadd.f32 %v346_v5, %v342_v17  ;;  %v371_v26 = vsel %vm65_vm2, %v365_v20, %v366_v21  ;;  %v357_v39 = vsel %vm42_vm3, %v351_v31, %v352_v23 }
 0x216   :  { %v370_v27 = vsel %vm65_vm2, %v366_v21, %v367_v22  ;;  %v356_v36 = vsel %vm42_vm3, %v352_v23, %v353_v24 }
 0x217   :  { %v380_v29 = vpack.c.bf16 %v350_v25, %v349_v16  ;;  %v374_v30 = vsel %vm939_vm5, %v370_v27, 0.0  ;;  %v354_v32 = vrot.slane %v350_v25, 7  ;;  %v368_v37 = vrot.slane %v350_v25, 1 }
 0x218   :  { %v377_v35 = vpack.c.bf16 %v374_v30, %v371_v26  ;;  %v361_v44 = vsel %vm960_vm7, %v356_v36, 0.0 }
 0x219   :  { %809 = vmatmul.mubr.msk.bf16.vlgmr.msra.gmra.mxu1 %vm281_vm8, %v380_v29  ;;  %v358_v38 = vsel %vm42_vm3, %v354_v32, %v351_v31  ;;  %v355_v33 = vsel %vm42_vm3, %v353_v24, %v354_v32  ;;  %v372_v41 = vsel %vm65_vm2, %v368_v37, %v365_v20  ;;  %v369_v47 = vsel %vm65_vm2, %v367_v22, %v368_v37 }
 0x21a   :  { %821 = vmatpush3.bf16.msra.mxu1 %v846_v48  ;;  %824 = vmatprep.mubr.msk.bf16.mxu1 %vm281_vm8, %v377_v35  ;;  %v359_v40 = vsel %vm929_vm4, %v358_v38, 0.0  ;;  %v364_v46 = vpack.c.bf16 %v355_v33, %v361_v44  ;;  %v376_v48 = vsel %vm952_vm6, %v372_v41, 0.0  ;;  %v867_v41 = vmov 0  }
 0x21b   :  { %v363_v43 = vpack.c.bf16 %v357_v39, %v359_v40  ;;  %822 = vmatprep.subr.bf16.mxu1 %v848_v34  ;;  %v378_v28 = vpack.c.bf16 %v376_v48, %v369_v47  ;;  %v865_v40 = vmov 0.0   ;;  %842 = vset.pattern.permute.xlu0 %v867_v41 }
 0x21c   :  { %828 = vmatprep.subr.bf16.mxu0 %v865_v40 }
 0x21d   :  { %816 = vmatprep.mubr.msk.bf16.mxu0 %vm281_vm8, %v363_v43 }
 0x21e   :  { %817 = vmatmul.mubr.msk.bf16.vlgmr.msra.gmra.mxu0 %vm281_vm8, %v364_v46  ;;  %823 = vmatpush3.bf16.msra.mxu1 %v848_v34 }
 0x21f   :  { %832 = vmatprep.mubr.msk.bf16.mxu0 %vm866_vm9, %v865_v40 }
 0x221   :  { %825 = vmatmul.mubr.msk.bf16.vlgmr.msra.gmra.mxu1 %vm281_vm8, %v378_v28 }
 0x2d9   :  { %v810_v49 = vpop.f32.mrf.mxu1 }
 0x2db   :  { %v441_v50 = vpop.f32.mrf.mxu1 }
 0x2dd   :  { %v811_v51 = vpop.f32.mrf.mxu1 }
 0x2de   :  { %v818_v52 = vpop.f32.mrf.mxu0 }
 0x2df   :  { %v517_v53 = vadd.f32 %v818_v52, %v810_v49  ;;  %v444_v55 = vpop.f32.mrf.mxu1 }
 0x2e0   :  { %v508_v56 = vpop.f32.mrf.mxu0 }
 0x2e1   :  { %v509_v57 = vadd.f32 %v508_v56, %v441_v50  ;;  %v826_v58 = vpop.f32.mrf.mxu1 }
 0x2e2   :  { %v596_v59 = vadd.f32 %v826_v58, %v517_v53  ;;  %v819_v60 = vpop.f32.mrf.mxu0  ;;  %v672_v58 = vsub.s32 5, %v913_v19 }
 0x2e3   :  { %v520_v61 = vadd.f32 %v819_v60, %v811_v51  ;;  %v579_v62 = vpop.f32.mrf.mxu1 }
 0x2e4   :  { %v604_v63 = vadd.f32 %v601_v42, %v596_v59  ;;  %v594_v0 = vadd.f32 %v579_v62, %v509_v57  ;;  %v511_v1 = vpop.f32.mrf.mxu0 }
 0x2e5   :  { %v512_v2 = vadd.f32 %v511_v1, %v444_v55  ;;  %v827_v3 = vpop.f32.mrf.mxu1  ;;  %v664_v55 = vsub.s32 4, %v913_v19 }
 0x2e6   :  { %v602_v4 = vadd.f32 %v601_v42, %v594_v0  ;;  %v597_v5 = vadd.f32 %v827_v3, %v520_v61  ;;  %v608_v6 = vmax.f32 %v604_v63, 0.0  ;;  %v673_v63 = vrot.slane %v973_v54, %v672_v58 }
 0x2e7   :  { %v582_v7 = vpop.f32.mrf.mxu1  ;;  %v665_v57 = vrot.slane %v973_v54, %v664_v55 }
 0x2e8   :  { %v605_v8 = vadd.f32 %v601_v42, %v597_v5  ;;  %v595_v9 = vadd.f32 %v582_v7, %v512_v2  ;;  %v616_v10 = vsel %vm281_vm8, %v608_v6, 0.0  ;;  %v606_v11 = vmax.f32 %v602_v4, 0.0 }
 0x2e9   :  { %617 = vadd.xlane.f32.xlu0 %v616_v10 }
 0x2ea   :  { %v603_v12 = vadd.f32 %v601_v42, %v595_v9  ;;  %v609_v13 = vmax.f32 %v605_v8, 0.0  ;;  %v610_v15 = vsel %vm281_vm8, %v606_v11, 0.0 }
 0x2ec   :  { %v619_v14 = vsel %vm281_vm8, %v609_v13, 0.0  ;;  %v607_v16 = vmax.f32 %v603_v12, 0.0 }
 0x2ed   :  { %620 = vadd.xlane.f32.xlu1 %v619_v14  ;;  %611 = vadd.xlane.f32.xlu0 %v610_v15 }
 0x2ee   :  { %v613_v17 = vsel %vm281_vm8, %v607_v16, 0.0 }
 0x2f1   :  { %614 = vadd.xlane.f32.xlu1 %v613_v17 }
 0x372   :  { %v618_v18 = vpop.xlane.xlu0 %617 }
 0x373   :  { %v624_v20 = vmul.f32 0.03125, %v618_v18 }
 0x375   :  { %v628_v21 = vsub.f32 %v608_v6, %v624_v20 }
 0x376   :  { %v621_v22 = vpop.xlane.xlu1 %620  ;;  %v612_v23 = vpop.xlane.xlu0 %611 }
 0x377   :  { %v625_v24 = vmul.f32 0.03125, %v621_v22  ;;  %v622_v25 = vmul.f32 0.03125, %v612_v23  ;;  %v632_v26 = vmul.f32 %v628_v21, %v628_v21 }
 0x379   :  { %v629_v27 = vsub.f32 %v609_v13, %v625_v24  ;;  %v626_v29 = vsub.f32 %v606_v11, %v622_v25  ;;  %v640_v30 = vsel %vm281_vm8, %v632_v26, 0.0  ;;  %v16_v13 = vpack.c.bf16 %v973_v54, %v973_v54 }
 0x37a   :  { %v615_v31 = vpop.xlane.xlu1 %614  ;;  %641 = vadd.xlane.f32.xlu0 %v640_v30 }
 0x37b   :  { %v623_v32 = vmul.f32 0.03125, %v615_v31  ;;  %v633_v34 = vmul.f32 %v629_v27, %v629_v27  ;;  %v630_v35 = vmul.f32 %v626_v29, %v626_v29  ;;  %v685_v14 = vrot.slane %v16_v13, 3 }
 0x37d   :  { %v627_v36 = vsub.f32 %v607_v16, %v623_v32  ;;  %v643_v37 = vsel %vm281_vm8, %v633_v34, 0.0  ;;  %v634_v38 = vsel %vm281_vm8, %v630_v35, 0.0 }
 0x37e   :  { %644 = vadd.xlane.f32.xlu1 %v643_v37  ;;  %635 = vadd.xlane.f32.xlu0 %v634_v38 }
 0x37f   :  { %v631_v33 = vmul.f32 %v627_v36, %v627_v36 }
 0x381   :  { %v637_v39 = vsel %vm281_vm8, %v631_v33, 0.0 }
 0x382   :  { %638 = vadd.xlane.f32.xlu1 %v637_v39 }
 0x394   :  { %682 = vperm.xlu0 %842, %v973_v54  }
 0x403   :  { %v642_v43 = vpop.xlane.xlu0 %641 }
 0x404   :  { %v648_v44 = vmul.f32 0.03125, %v642_v43 }
 0x406   :  { %v652_v46 = vadd.f32 1e-05, %v648_v44 }
 0x407   :  { %v645_v47 = vpop.xlane.xlu1 %644  ;;  %v636_v48 = vpop.xlane.xlu0 %635 }
 0x408   :  { %857 = vrsqrt.f32 %v652_v46  ;;  %v649_v28 = vmul.f32 0.03125, %v645_v47  ;;  %v646_v49 = vmul.f32 0.03125, %v636_v48 }
 0x40a   :  { %v653_v50 = vadd.f32 1e-05, %v649_v28  ;;  %v650_v45 = vadd.f32 1e-05, %v646_v49 }
 0x40b   :  { %v639_v51 = vpop.xlane.xlu1 %638 }
 0x40c   :  { %859 = vrsqrt.f32 %v653_v50  ;;  %v647_v52 = vmul.f32 0.03125, %v639_v51 }
 0x40d   :  { %861 = vrsqrt.f32 %v650_v45 }
 0x40e   :  { %v651_v53 = vadd.f32 1e-05, %v647_v52 }
 0x40f   :  { %v683_v15 = vpop.permute.xlu0 %682 }
 0x410   :  { %863 = vrsqrt.f32 %v651_v53  ;;  %v686_v16 = vrot.slane %v683_v15, 7 }
 0x415   :  { %v858_v56 = vpop.eup %857 }
 0x416   :  { %v660_v42 = vmul.f32 %v858_v56, %v628_v21 }
 0x418   :  { %v668_v62 = vmul.f32 %v665_v57, %v660_v42 }
 0x419   :  { %v860_v59 = vpop.eup %859 }
 0x41a   :  { %v862_v60 = vpop.eup %861  ;;  %v661_v61 = vmul.f32 %v860_v59, %v629_v27  ;;  %v676_v3 = vadd.f32 %v673_v63, %v668_v62 }
 0x41b   :  { %v658_v1 = vmul.f32 %v862_v60, %v626_v29 }
 0x41c   :  { %v669_v0 = vmul.f32 %v665_v57, %v661_v61 }
 0x41d   :  { %v864_v2 = vpop.eup %863  ;;  %v666_v7 = vmul.f32 %v665_v57, %v658_v1 }
 0x41e   :  { %v677_v4 = vadd.f32 %v673_v63, %v669_v0  ;;  %v659_v5 = vmul.f32 %v864_v2, %v627_v36 }
 0x41f   :  { %v674_v19 = vadd.f32 %v673_v63, %v666_v7 }
 0x420   :  { %v679_v6 = vpack.c.bf16 %v677_v4, %v676_v3  ;;  %v667_v8 = vmul.f32 %v665_v57, %v659_v5 }
 0x422   :  { %v695_v9 = vsel %vm281_vm8, %v679_v6, 0  ;;  %v675_v10 = vadd.f32 %v673_v63, %v667_v8 }
 0x423   :  { %829 = vmatpush3.bf16.xpose.msra.mxu0 %v695_v9 }
 0x424   :  { %830 = vmatprep.subr.bf16.mxu0 %v865_v40  ;;  %v678_v11 = vpack.c.bf16 %v675_v10, %v674_v19 }
 0x426   :  { %v692_v12 = vsel %vm281_vm8, %v678_v11, 0 }
 0x42b   :  { %831 = vmatpush3.bf16.xpose.msra.mxu0 %v692_v12 }
 0x432   :  { %833 = vmatmul.mubr.msk.bf16.vlgmr.msra.gmra.mxu0 %vm281_vm8, %v685_v14 }
 0x4f2   :  { %v731_v17 = vpop.f32.mrf.mxu0 }
 0x4f3   :  { %v732_v18 = vadd.f32 %v731_v17, %v686_v16 }
 0x4f4   :  { %v834_v20 = vpop.f32.mrf.mxu0 }
 0x4f5   :  { %738 = vst.msk [vmem:[%s1062_s3] sm:$0x1] %vm737_vm10, %v732_v18 }
 0x4f6   :  { %v734_v21 = vpop.f32.mrf.mxu0 }
 0x4f8   :  { %v835_v22 = vpop.f32.mrf.mxu0 }

</bundles_post_ra>
